<compile_context>
chip_gen: v7x
topology: tpu7x:2x2x1
jax: 0.10.0
libtpu: 0.0.40
codegen_flags: <defaults>
</compile_context>

<pallas_src>
import functools

import jax
import jax.numpy as jnp
from jax.experimental import pallas as pl
from jax.experimental.pallas import tpu as pltpu

_EPS = 1e-8


def _footprint_bytes(tw, c, itemsize, rows, mask_itemsize):
    """Approximate per-step VMEM residency for a pixel tile of width tw."""
    c_pad = -(-c // 8) * 8                       # sublane padding of the C axis
    xs = 2 * 2 * c_pad * tw * itemsize           # x & target, double-buffered
    mb = 2 * 8 * tw * mask_itemsize              # mask block (1 sublane pads to 8)
    ob = 2 * rows * 128 * 4                      # narrow lane-reduced output block
    return xs + mb + ob


def _vmem_budget():
    """(per-step tile budget, physical VMEM bytes) derived from the chip."""
    phys = 64 << 20                              # conservative fallback (v7x per-core)
    try:
        phys = int(pltpu.get_tpu_info().vmem_capacity_bytes)
    except Exception:
        pass
    # v5e/v6e (128 MiB) -> 24 MiB tile budget; v7x (64 MiB) -> 16 MiB.
    return min(24 << 20, phys // 4), phys


def _choose_tile(hw, c, itemsize, rows, mask_itemsize, budget_bytes, target):
    """Largest 128*2^k pixel tile (<= hw, <= target) fitting the VMEM budget."""
    if hw <= 128:
        return hw                                # full extent (block == array dim)
    tw = 128
    while (tw * 2 <= hw and tw * 2 <= target and
           _footprint_bytes(tw * 2, c, itemsize, rows, mask_itemsize)
           <= budget_bytes):
        tw *= 2
    return tw


def _lane_fold(a):
    """[r, W] -> [r, min(W,128)] partial sums via pow2 lane-aligned halving."""
    w = a.shape[-1]
    while w > 128:
        w //= 2
        a = a[:, :w] + a[:, w:]
    return a


def _cos_loss_kernel(*refs, hw, tile_hw, tiles_per_chunk, num_labels,
                     has_mask, needs_valid):
    """Per (batch n, chunk c, pixel-tile t) cosine loss + lane-folded accumulation.

    Output-block row layout (resident [1, rows, <=128] accumulator):
      has_mask=False:     row 0: sum(temp)
      num_labels is None: row 0: sum(temp*obj), row 1: count(obj),
                          row 2: sum(temp*bg),  row 3: count(bg)
      num_labels = L:     rows [0,L): per-label sum(temp), rows [L,2L): counts,
                          row 2L: sum(temp*bg), row 2L+1: count(bg)
    """
    if has_mask:
        x_ref, t_ref, m_ref, out_ref = refs
    else:
        x_ref, t_ref, out_ref = refs

    t_idx = pl.program_id(2)

    @pl.when(t_idx == 0)
    def _init():
        out_ref[...] = jnp.zeros_like(out_ref)

    x = x_ref[0].astype(jnp.float32)             # [C, TW]
    y = t_ref[0].astype(jnp.float32)             # [C, TW]

    # Per-pixel cosine similarity over the channel (sublane) axis.
    dot = jnp.sum(x * y, axis=0, keepdims=True)  # [1, TW]
    nx = jnp.sum(x * x, axis=0, keepdims=True)
    ny = jnp.sum(y * y, axis=0, keepdims=True)
    # Clamp BEFORE rsqrt so this matches max(||x||*||y||, EPS) in fp32.
    inv = jax.lax.rsqrt(jnp.maximum(nx * ny, _EPS * _EPS))
    temp = 0.5 - 0.5 * (dot * inv)               # [1, TW]

    valid = None
    if needs_valid:
        base = (pl.program_id(1) * tiles_per_chunk + t_idx) * tile_hw
        lane = jax.lax.broadcasted_iota(jnp.int32, (1, tile_hw), 1)
        valid = (lane + base) < hw               # [1, TW] bool
        temp = jnp.where(valid, temp, 0.0)       # squash stale-garbage lanes

    if not has_mask:
        out_ref[:, 0:1, :] += _lane_fold(temp)[None]
        return

    m = m_ref[0].astype(jnp.int32)               # [1, TW] (streamed as int8)
    is_obj = m >= 2                              # mask.clamp(0,2) == 2
    is_bg = m < 2
    if needs_valid:
        is_obj = jnp.logical_and(is_obj, valid)
        is_bg = jnp.logical_and(is_bg, valid)
    bgf = is_bg.astype(jnp.float32)

    if num_labels is None:
        objf = is_obj.astype(jnp.float32)
        out_ref[:, 0:1, :] += _lane_fold(temp * objf)[None]
        out_ref[:, 1:2, :] += _lane_fold(objf)[None]
        out_ref[:, 2:3, :] += _lane_fold(temp * bgf)[None]
        out_ref[:, 3:4, :] += _lane_fold(bgf)[None]
    else:
        L = num_labels
        # One-hot over object labels 2 .. L+1 (labels on sublanes).
        labels = jax.lax.broadcasted_iota(jnp.int32, (L, tile_hw), 0) + 2
        onehot = m == labels                     # [L, TW]
        if needs_valid:
            onehot = jnp.logical_and(onehot, valid)
        onehot = onehot.astype(jnp.float32)
        out_ref[:, 0:L, :] += _lane_fold(onehot * temp)[None]
        out_ref[:, L:2 * L, :] += _lane_fold(onehot)[None]
        out_ref[:, 2 * L:2 * L + 1, :] += _lane_fold(temp * bgf)[None]
        out_ref[:, 2 * L + 1:2 * L + 2, :] += _lane_fold(bgf)[None]


@functools.partial(jax.jit,
                   static_argnames=("weighted", "num_labels", "tile_target"))
def cosine_similarity_loss_masked(x, target, mask=None, *, weighted=False,
                                  num_labels=8, tile_target=32768):
    """Matches CosineSimilarityLossMasked.forward.

    x, target: [N, C, H, W] float tensors.
    mask:      [N, H, W] with values {0,1,2,...,K+1} (assumed < 128), or None.
    weighted:  per-object weighting (object labels assumed < 2 + num_labels).
    """
    N, C, H, W = x.shape
    HW = H * W

    xr = x.reshape(N, C, HW)
    tr = target.reshape(N, C, HW)

    has_mask = mask is not None
    # TODO(synk): weighted path bounds object labels to [2, 2+num_labels);
    # torch.unique over arbitrary labels has no static-shape Pallas equivalent.
    L = num_labels if (weighted and has_mask) else None
    rows = 1 if not has_mask else (4 if L is None else 2 * num_labels + 2)

    itemsize = jnp.dtype(x.dtype).itemsize
    mask_itemsize = 1 if has_mask else 0

    budget, phys = _vmem_budget()
    tw = _choose_tile(HW, C, itemsize, rows, mask_itemsize, budget,
                      max(128, tile_target))
    ow = min(tw, 128)

    num_tiles = -(-HW // tw)
    # Split the tile range in two when N is odd so both v7x cores stay busy.
    num_chunks = 2 if (N % 2 == 1 and num_tiles % 2 == 0) else 1
    tiles_per_chunk = num_tiles // num_chunks
    needs_valid = (num_tiles * tw != HW)

    kernel = functools.partial(
        _cos_loss_kernel, hw=HW, tile_hw=tw, tiles_per_chunk=tiles_per_chunk,
        num_labels=L, has_mask=has_mask, needs_valid=needs_valid)

    def px_map(n, c, t):
        return (n, 0, c * tiles_per_chunk + t)

    in_specs = [pl.BlockSpec((1, C, tw), px_map),
                pl.BlockSpec((1, C, tw), px_map)]
    args = [xr, tr]
    if has_mask:
        m8 = mask.astype(jnp.int8).reshape(N, 1, HW)   # 4x less HBM traffic
        in_specs.append(pl.BlockSpec((1, 1, tw), px_map))
        args.append(m8)

    out_bytes = N * num_chunks * rows * ow * 4
    cost = pl.CostEstimate(
        flops=int(N * HW * (6 * C + 12)),
        transcendentals=int(N * HW),
        bytes_accessed=int(2 * N * C * HW * itemsize
                           + N * HW * mask_itemsize + out_bytes))

    fp = _footprint_bytes(tw, C, itemsize, rows, mask_itemsize)
    # Explicit scoped-VMEM limit: >= 32 MiB (raises v5e's 16 MiB default),
    # never more than half of physical (safe on v7x's 64 MiB).
    vmem_limit = int(min(phys // 2, max(32 << 20, 2 * fp + (8 << 20))))

    acc = pl.pallas_call(
        kernel,
        out_shape=jax.ShapeDtypeStruct((N * num_chunks, rows, ow), jnp.float32),
        grid_spec=pltpu.PrefetchScalarGridSpec(
            num_scalar_prefetch=0,
            grid=(N, num_chunks, tiles_per_chunk),
            in_specs=in_specs,
            out_specs=pl.BlockSpec(
                (1, rows, ow), lambda n, c, t: (n * num_chunks + c, 0, 0)),
        ),
        compiler_params=pltpu.CompilerParams(
            dimension_semantics=("parallel", "parallel", "arbitrary"),
            vmem_limit_bytes=vmem_limit),
        cost_estimate=cost,
    )(*args)

    sums = jnp.sum(acc, axis=(0, 2))   # tiny [rows] reduction in plain JAX

    if not has_mask:
        # Divides by x.numel() (N*C*H*W) — matches the PyTorch reference.
        return sums[0] / float(N * C * H * W)

    if L is None:
        obj_sum, obj_cnt, bg_sum, bg_cnt = sums[0], sums[1], sums[2], sums[3]
        obj_loss = jnp.where(obj_cnt > 0,
                             obj_sum / jnp.maximum(obj_cnt, 1.0), 0.0)
    else:
        lab_sum = sums[:L]
        lab_cnt = sums[L:2 * L]
        bg_sum = sums[2 * L]
        bg_cnt = sums[2 * L + 1]
        present = lab_cnt > 0
        per_label = jnp.where(present,
                              lab_sum / jnp.where(present, lab_cnt, 1.0), 0.0)
        n_present = jnp.sum(present.astype(jnp.float32))
        obj_loss = jnp.where(n_present > 0,
                             jnp.sum(per_label) / jnp.maximum(n_present, 1.0),
                             0.0)

    bg_loss = jnp.where(bg_cnt > 0,
                        0.1 * bg_sum / jnp.maximum(bg_cnt, 1.0), 0.0)
    return obj_loss + bg_loss


def _reference(x, target, mask=None, weighted=False, max_labels=8):
    """Pure-JAX replica of the PyTorch forward, for sanity checking."""
    dot = jnp.sum(x * target, axis=1)
    nx = jnp.sqrt(jnp.sum(x * x, axis=1))
    nt = jnp.sqrt(jnp.sum(target * target, axis=1))
    temp = 0.5 * (1.0 - dot / jnp.maximum(nx * nt, _EPS))   # [N, H, W]
    if mask is None:
        return jnp.sum(temp) / float(x.size)
    obj = mask >= 2
    bg = jnp.logical_not(obj)
    if weighted:
        w = jnp.zeros_like(temp)
        for lab in range(2, 2 + max_labels):
            sel = mask == lab
            npix = jnp.sum(sel.astype(jnp.float32))
            w = jnp.where(jnp.logical_and(sel, npix > 0),
                          1.0 / jnp.maximum(npix, 1.0), w)
    else:
        w = obj.astype(jnp.float32)
    obj_loss = jnp.where(jnp.sum(obj) > 0,
                         jnp.sum(temp * w) / jnp.maximum(jnp.sum(w), 1e-30), 0.0)
    bg_f = bg.astype(jnp.float32)
    bg_loss = jnp.where(jnp.sum(bg_f) > 0,
                        0.1 * jnp.sum(temp * bg_f) / jnp.maximum(jnp.sum(bg_f), 1.0),
                        0.0)
    return obj_loss + bg_loss


if __name__ == "__main__":
    key = jax.random.PRNGKey(0)
    kx, kt, km, kx2, kt2, km2 = jax.random.split(key, 6)

    N, C, H, W = 2, 4, 16, 16
    x = jax.random.normal(kx, (N, C, H, W), dtype=jnp.float32)
    target = jax.random.normal(kt, (N, C, H, W), dtype=jnp.float32)
    # mask values in {0,1,2,3,4}: 0/1 = background, 2..4 = object labels.
    mask = jax.random.randint(km, (N, H, W), 0, 5, dtype=jnp.int32)

    # Unweighted, with mask.
    loss = jax.block_until_ready(
        cosine_similarity_loss_masked(x, target, mask, weighted=False))
    ref = jax.block_until_ready(_reference(x, target, mask, weighted=False))
    assert jnp.allclose(loss, ref, rtol=1e-5, atol=1e-5), (loss, ref)

    # Weighted, with mask.
    loss_w = jax.block_until_ready(
        cosine_similarity_loss_masked(x, target, mask, weighted=True,
                                      num_labels=8))
    ref_w = jax.block_until_ready(
        _reference(x, target, mask, weighted=True, max_labels=8))
    assert jnp.allclose(loss_w, ref_w, rtol=1e-5, atol=1e-5), (loss_w, ref_w)

    # mask=None path (maskless kernel variant).
    loss_n = jax.block_until_ready(
        cosine_similarity_loss_masked(x, target, None))
    ref_n = jax.block_until_ready(_reference(x, target, None))
    assert jnp.allclose(loss_n, ref_n, rtol=1e-5, atol=1e-5), (loss_n, ref_n)

    # Odd batch + multi-tile: exercises the 2-chunk parallel grid, the
    # partial-tile valid masking and the weighted label path together.
    N2, H2, W2 = 1, 24, 24
    x2 = jax.random.normal(kx2, (N2, C, H2, W2), dtype=jnp.float32)
    t2 = jax.random.normal(kt2, (N2, C, H2, W2), dtype=jnp.float32)
    m2 = jax.random.randint(km2, (N2, H2, W2), 0, 5, dtype=jnp.int32)
    loss2 = jax.block_until_ready(
        cosine_similarity_loss_masked(x2, t2, m2, weighted=True, num_labels=8))
    ref2 = jax.block_until_ready(
        _reference(x2, t2, m2, weighted=True, max_labels=8))
    assert jnp.allclose(loss2, ref2, rtol=1e-5, atol=1e-5), (loss2, ref2)

    print("KERNEL_OK")
</pallas_src>

<mosaic_0001>
module attributes {stable_mosaic.version = 11 : i64} {
  func.func @_cos_loss_kernel(%arg0: i32, %arg1: i32, %arg2: i32, %arg3: memref<1x4x256xf32, #tpu.memory_space<vmem>>, %arg4: memref<1x4x256xf32, #tpu.memory_space<vmem>>, %arg5: memref<1x1x256xi8, #tpu.memory_space<vmem>>, %arg6: memref<1x4x128xf32, #tpu.memory_space<vmem>>) attributes {dimension_semantics = [#tpu.dimension_semantics<parallel>, #tpu.dimension_semantics<parallel>, #tpu.dimension_semantics<arbitrary>], iteration_bounds = array<i64: 2, 1, 1>, scalar_prefetch = 0 : i64, scratch_operands = 0 : i64, tpu.core_type = #tpu.core_type<tc>, window_params = [{transform_indices = @transform_0, window_bounds = array<i64: 1, 4, 256>}, {transform_indices = @transform_1, window_bounds = array<i64: 1, 4, 256>}, {transform_indices = @transform_2, window_bounds = array<i64: 1, 1, 256>}, {transform_indices = @transform_3, window_bounds = array<i64: 1, 4, 128>}]} {
    %c0_i32 = arith.constant 0 : i32
    %0 = arith.cmpi eq, %arg2, %c0_i32 : i32
    %1 = arith.extui %0 : i1 to i32
    %c0_i32_0 = arith.constant 0 : i32
    %2 = arith.cmpi ne, %1, %c0_i32_0 : i32
    scf.if %2 {
      %cst_36 = arith.constant 0.000000e+00 : f32
      %66 = vector.broadcast %cst_36 : f32 to vector<1x4x128xf32>
      %c0_37 = arith.constant 0 : index
      %c0_38 = arith.constant 0 : index
      %c0_39 = arith.constant 0 : index
      %67 = vector.load %arg6[%c0_37, %c0_38, %c0_39] : memref<1x4x128xf32, #tpu.memory_space<vmem>>, vector<1x4x128xf32>
      tpu.vector_store %arg6[%c0_37, %c0_38, %c0_39], %66 {strides = array<i32>} : memref<1x4x128xf32, #tpu.memory_space<vmem>>, vector<1x4x128xf32>,
    } else {
    }
    %c0 = arith.constant 0 : index
    %c0_1 = arith.constant 0 : index
    %c0_2 = arith.constant 0 : index
    %3 = vector.load %arg3[%c0, %c0_1, %c0_2] : memref<1x4x256xf32, #tpu.memory_space<vmem>>, vector<1x4x256xf32>
    %4 = vector.shape_cast %3 : vector<1x4x256xf32> to vector<4x256xf32>
    %c0_3 = arith.constant 0 : index
    %c0_4 = arith.constant 0 : index
    %c0_5 = arith.constant 0 : index
    %5 = vector.load %arg4[%c0_3, %c0_4, %c0_5] : memref<1x4x256xf32, #tpu.memory_space<vmem>>, vector<1x4x256xf32>
    %6 = vector.shape_cast %5 : vector<1x4x256xf32> to vector<4x256xf32>
    %7 = arith.mulf %4, %6 : vector<4x256xf32>
    %cst = arith.constant dense<0.000000e+00> : vector<256xf32>
    %8 = vector.multi_reduction <add>, %7, %cst [0] : vector<4x256xf32> to vector<256xf32>
    %9 = vector.shape_cast %8 : vector<256xf32> to vector<1x256xf32>
    %10 = arith.mulf %4, %4 : vector<4x256xf32>
    %cst_6 = arith.constant dense<0.000000e+00> : vector<256xf32>
    %11 = vector.multi_reduction <add>, %10, %cst_6 [0] : vector<4x256xf32> to vector<256xf32>
    %12 = vector.shape_cast %11 : vector<256xf32> to vector<1x256xf32>
    %13 = arith.mulf %6, %6 : vector<4x256xf32>
    %cst_7 = arith.constant dense<0.000000e+00> : vector<256xf32>
    %14 = vector.multi_reduction <add>, %13, %cst_7 [0] : vector<4x256xf32> to vector<256xf32>
    %15 = vector.shape_cast %14 : vector<256xf32> to vector<1x256xf32>
    %16 = arith.mulf %12, %15 : vector<1x256xf32>
    %cst_8 = arith.constant 1.000000e-16 : f32
    %17 = vector.broadcast %cst_8 : f32 to vector<1x256xf32>
    %18 = arith.maximumf %16, %17 : vector<1x256xf32>
    %19 = math.rsqrt %18 : vector<1x256xf32>
    %20 = arith.mulf %9, %19 : vector<1x256xf32>
    %cst_9 = arith.constant 5.000000e-01 : f32
    %21 = vector.broadcast %cst_9 : f32 to vector<1x256xf32>
    %22 = arith.mulf %21, %20 : vector<1x256xf32>
    %cst_10 = arith.constant 5.000000e-01 : f32
    %23 = vector.broadcast %cst_10 : f32 to vector<1x256xf32>
    %24 = arith.subf %23, %22 : vector<1x256xf32>
    %c0_11 = arith.constant 0 : index
    %c0_12 = arith.constant 0 : index
    %c0_13 = arith.constant 0 : index
    %25 = vector.load %arg5[%c0_11, %c0_12, %c0_13] : memref<1x1x256xi8, #tpu.memory_space<vmem>>, vector<1x1x256xi8>
    %26 = vector.shape_cast %25 : vector<1x1x256xi8> to vector<1x256xi8>
    %27 = arith.extsi %26 : vector<1x256xi8> to vector<1x256xi32>
    %c2_i32 = arith.constant 2 : i32
    %28 = vector.broadcast %c2_i32 : i32 to vector<1x256xi32>
    %29 = arith.cmpi sge, %27, %28 : vector<1x256xi32>
    %c2_i32_14 = arith.constant 2 : i32
    %30 = vector.broadcast %c2_i32_14 : i32 to vector<1x256xi32>
    %31 = arith.cmpi slt, %27, %30 : vector<1x256xi32>
    %32 = arith.extui %31 : vector<1x256xi1> to vector<1x256xi32>
    %33 = arith.sitofp %32 : vector<1x256xi32> to vector<1x256xf32>
    %34 = arith.extui %29 : vector<1x256xi1> to vector<1x256xi32>
    %35 = arith.sitofp %34 : vector<1x256xi32> to vector<1x256xf32>
    %c0_15 = arith.constant 0 : index
    %c0_16 = arith.constant 0 : index
    %c0_17 = arith.constant 0 : index
    %36 = vector.load %arg6[%c0_15, %c0_16, %c0_17] : memref<1x4x128xf32, #tpu.memory_space<vmem>>, vector<1x1x128xf32>
    %37 = arith.mulf %24, %35 : vector<1x256xf32>
    %38 = vector.extract_strided_slice %37 {offsets = [0, 0], sizes = [1, 128], strides = [1, 1]} : vector<1x256xf32> to vector<1x128xf32>
    %39 = vector.extract_strided_slice %37 {offsets = [0, 128], sizes = [1, 128], strides = [1, 1]} : vector<1x256xf32> to vector<1x128xf32>
    %40 = arith.addf %38, %39 : vector<1x128xf32>
    %41 = vector.shape_cast %40 : vector<1x128xf32> to vector<1x1x128xf32>
    %42 = arith.addf %36, %41 : vector<1x1x128xf32>
    %c0_18 = arith.constant 0 : index
    %c0_19 = arith.constant 0 : index
    %c0_20 = arith.constant 0 : index
    %43 = vector.load %arg6[%c0_18, %c0_19, %c0_20] : memref<1x4x128xf32, #tpu.memory_space<vmem>>, vector<1x1x128xf32>
    tpu.vector_store %arg6[%c0_18, %c0_19, %c0_20], %42 {strides = array<i32>} : memref<1x4x128xf32, #tpu.memory_space<vmem>>, vector<1x1x128xf32>,
    %c0_21 = arith.constant 0 : index
    %c1 = arith.constant 1 : index
    %c0_22 = arith.constant 0 : index
    %44 = vector.load %arg6[%c0_21, %c1, %c0_22] : memref<1x4x128xf32, #tpu.memory_space<vmem>>, vector<1x1x128xf32>
    %45 = vector.extract_strided_slice %35 {offsets = [0, 0], sizes = [1, 128], strides = [1, 1]} : vector<1x256xf32> to vector<1x128xf32>
    %46 = vector.extract_strided_slice %35 {offsets = [0, 128], sizes = [1, 128], strides = [1, 1]} : vector<1x256xf32> to vector<1x128xf32>
    %47 = arith.addf %45, %46 : vector<1x128xf32>
    %48 = vector.shape_cast %47 : vector<1x128xf32> to vector<1x1x128xf32>
    %49 = arith.addf %44, %48 : vector<1x1x128xf32>
    %c0_23 = arith.constant 0 : index
    %c1_24 = arith.constant 1 : index
    %c0_25 = arith.constant 0 : index
    %50 = vector.load %arg6[%c0_23, %c1_24, %c0_25] : memref<1x4x128xf32, #tpu.memory_space<vmem>>, vector<1x1x128xf32>
    tpu.vector_store %arg6[%c0_23, %c1_24, %c0_25], %49 {strides = array<i32>} : memref<1x4x128xf32, #tpu.memory_space<vmem>>, vector<1x1x128xf32>,
    %c0_26 = arith.constant 0 : index
    %c2 = arith.constant 2 : index
    %c0_27 = arith.constant 0 : index
    %51 = vector.load %arg6[%c0_26, %c2, %c0_27] : memref<1x4x128xf32, #tpu.memory_space<vmem>>, vector<1x1x128xf32>
    %52 = arith.mulf %24, %33 : vector<1x256xf32>
    %53 = vector.extract_strided_slice %52 {offsets = [0, 0], sizes = [1, 128], strides = [1, 1]} : vector<1x256xf32> to vector<1x128xf32>
    %54 = vector.extract_strided_slice %52 {offsets = [0, 128], sizes = [1, 128], strides = [1, 1]} : vector<1x256xf32> to vector<1x128xf32>
    %55 = arith.addf %53, %54 : vector<1x128xf32>
    %56 = vector.shape_cast %55 : vector<1x128xf32> to vector<1x1x128xf32>
    %57 = arith.addf %51, %56 : vector<1x1x128xf32>
    %c0_28 = arith.constant 0 : index
    %c2_29 = arith.constant 2 : index
    %c0_30 = arith.constant 0 : index
    %58 = vector.load %arg6[%c0_28, %c2_29, %c0_30] : memref<1x4x128xf32, #tpu.memory_space<vmem>>, vector<1x1x128xf32>
    tpu.vector_store %arg6[%c0_28, %c2_29, %c0_30], %57 {strides = array<i32>} : memref<1x4x128xf32, #tpu.memory_space<vmem>>, vector<1x1x128xf32>,
    %c0_31 = arith.constant 0 : index
    %c3 = arith.constant 3 : index
    %c0_32 = arith.constant 0 : index
    %59 = vector.load %arg6[%c0_31, %c3, %c0_32] : memref<1x4x128xf32, #tpu.memory_space<vmem>>, vector<1x1x128xf32>
    %60 = vector.extract_strided_slice %33 {offsets = [0, 0], sizes = [1, 128], strides = [1, 1]} : vector<1x256xf32> to vector<1x128xf32>
    %61 = vector.extract_strided_slice %33 {offsets = [0, 128], sizes = [1, 128], strides = [1, 1]} : vector<1x256xf32> to vector<1x128xf32>
    %62 = arith.addf %60, %61 : vector<1x128xf32>
    %63 = vector.shape_cast %62 : vector<1x128xf32> to vector<1x1x128xf32>
    %64 = arith.addf %59, %63 : vector<1x1x128xf32>
    %c0_33 = arith.constant 0 : index
    %c3_34 = arith.constant 3 : index
    %c0_35 = arith.constant 0 : index
    %65 = vector.load %arg6[%c0_33, %c3_34, %c0_35] : memref<1x4x128xf32, #tpu.memory_space<vmem>>, vector<1x1x128xf32>
    tpu.vector_store %arg6[%c0_33, %c3_34, %c0_35], %64 {strides = array<i32>} : memref<1x4x128xf32, #tpu.memory_space<vmem>>, vector<1x1x128xf32>,
    return
  }
  func.func @transform_0(%arg0: i32, %arg1: i32, %arg2: i32) -> (i32, i32, i32) {
    %c1_i32 = arith.constant 1 : i32
    %0 = arith.muli %arg1, %c1_i32 : i32
    %1 = arith.addi %0, %arg2 : i32
    %c0_i32 = arith.constant 0 : i32
    %c0_i32_0 = arith.constant 0 : i32
    return %arg0, %c0_i32, %1 : i32, i32, i32
  }
  func.func @transform_1(%arg0: i32, %arg1: i32, %arg2: i32) -> (i32, i32, i32) {
    %c1_i32 = arith.constant 1 : i32
    %0 = arith.muli %arg1, %c1_i32 : i32
    %1 = arith.addi %0, %arg2 : i32
    %c0_i32 = arith.constant 0 : i32
    %c0_i32_0 = arith.constant 0 : i32
    return %arg0, %c0_i32, %1 : i32, i32, i32
  }
  func.func @transform_2(%arg0: i32, %arg1: i32, %arg2: i32) -> (i32, i32, i32) {
    %c1_i32 = arith.constant 1 : i32
    %0 = arith.muli %arg1, %c1_i32 : i32
    %1 = arith.addi %0, %arg2 : i32
    %c0_i32 = arith.constant 0 : i32
    %c0_i32_0 = arith.constant 0 : i32
    return %arg0, %c0_i32, %1 : i32, i32, i32
  }
  func.func @transform_3(%arg0: i32, %arg1: i32, %arg2: i32) -> (i32, i32, i32) {
    %c1_i32 = arith.constant 1 : i32
    %0 = arith.muli %arg0, %c1_i32 : i32
    %1 = arith.addi %0, %arg1 : i32
    %c0_i32 = arith.constant 0 : i32
    %c0_i32_0 = arith.constant 0 : i32
    %c0_i32_1 = arith.constant 0 : i32
    return %1, %c0_i32, %c0_i32_0 : i32, i32, i32
  }
}

</mosaic_0001>

<bundles_post_ra>
// kernel: cosine_similarity_loss_masked.1
= control target key start
LH: loop header
LB: loop body
LE: loop exit
PB: predicated region body
PF: predicated region fallthrough
CT: control target
= control target key end

     0   :  { %s625_s12 = smov 0   ;;  %s627_s13 = smov 0   ;;  %s687_s0 = inlined_call_operand.vmem [shape: f32[2,4,256], index: 0, kind: input, shape index: {}]   ;;  %s688_s1 = inlined_call_operand.vmem [shape: f32[2,4,256], index: 1, kind: input, shape index: {}]   ;;  %s689_s2 = inlined_call_operand.vmem [shape: s8[2,1,256], index: 2, kind: input, shape index: {}]   ;;  %s690_s3 = inlined_call_operand.vmem [shape: f32[2,4,128], index: 3, kind: output, shape index: {}]  }
   0x1   :  { %s629_s14 = smov 0  }
   0x2 LB: > { %s32_s15 = sadd.s32 1, %s598_s13  ;;  %p538_p0 = scmp.ge.s32.totalorder %s602_s14, 1  ;;  %s602_s14 = sphi %s629_s14, %s13_s14   ;;  %s598_s13 = sphi %s627_s13, %s692_s13   ;;  %s594_s12 = sphi %s625_s12, %s691_s12  }
   0x3   : > { %p34_p1 = scmp.ge.s32.totalorder %s32_s15, 2  ;;  %p210_p2 = scmp.lt.s32.totalorder %s602_s14, 3 }
   0x5   : > { %s694_s15 = smov (%p34_p1, %s32_s15), 0  ;;  %p211_p3 = pnand %p538_p0, %p210_p2 }
   0x6   : > { %p260_p4 = scmp.lt.s32.totalorder (!%p211_p3), %s594_s12, 1  ;;  %vm310_vm0 = vcmask (!%p211_p3), 1043456   ;;  %v604_v5 = vmov (!%p211_p3), 0.0   ;;  %v383_v62 = vlaneseq (!%p211_p3) }
   0x7   : > { %214 = sbr.rel (%p211_p3) target bundleno = 64 (0x40), region = 32 }
   0xe   : > { %s696_s12 = smov (!%p260_p4, %s594_s12), 1 }
   0xf   : > { %s549_s16 = sshll.u32 %s696_s12, 3  ;;  %s543_s17 = sshll.u32 %s696_s12, 1 }
  0x10   : > { %s267_s20 = scalar_lea.vmem %s687_s0, %s549_s16  ;;  %s279_s23 = scalar_lea.vmem %s688_s1, %s549_s16 }
  0x11   : > { %s290_s26 = scalar_lea.vmem %s689_s2, %s543_s17  ;;  %s544_s27 = sshll.u32 %s696_s12, 2  ;;  %v304_v0 = vld [vmem:[%s267_s20] sm:$0xff] }
  0x12   : > { %v305_v1 = vld [vmem:[%s279_s23] sm:$0xff]  ;;  %s655_s30 = scalar_lea.vmem %s690_s3, %s544_s27  ;;  %v325_v2 = vmul.f32 %v304_v0, %v304_v0 }
  0x13   : > { %v343_v3 = vmul.f32 %v305_v1, %v305_v1  ;;  %v373_v4 = vld [vmem:[%s290_s26] sm:$0x3]  ;;  %303 = vst [vmem:[%s655_s30] sm:$0xf] %v604_v5  ;;  %v306_v13 = vmul.f32 %v305_v1, %v304_v0  ;;  %v384_v1 = vshrl.u32 %v383_v62, 7 }
  0x14   : > { %v374_v6 = vunpack.c.0.s8 %v373_v4  ;;  %v327_v7 = vcombine.high %v325_v2, %v325_v2  ;;  %v329_v8 = vsel %vm310_vm0, %v325_v2, 0.0 }
  0x15   : > { %v345_v9 = vcombine.high %v343_v3, %v343_v3  ;;  %v347_v10 = vsel %vm310_vm0, %v343_v3, 0.0  ;;  %v330_v11 = vrot.slane %v329_v8, 4  ;;  %v308_v28 = vcombine.high %v306_v13, %v306_v13 }
  0x16   : > { %v348_v12 = vrot.slane %v347_v10, 4  ;;  %vm375_vm1 = vcmp.ge.s32.totalorder %v374_v6, 2  ;;  %vm376_vm2 = vcmp.lt.s32.totalorder %v374_v6, 2  ;;  %v336_v14 = vsel %vm310_vm0, %v327_v7, 0.0 }
  0x17   : > { %v354_v15 = vsel %vm310_vm0, %v345_v9, 0.0  ;;  %v662_v16 = vsel %vm375_vm1, 1.0, %v604_v5  ;;  %v331_v17 = vadd.f32 %v330_v11, %v329_v8  ;;  %v337_v18 = vrot.slane %v336_v14, 4 }
  0x18   : > { %v349_v19 = vadd.f32 %v348_v12, %v347_v10  ;;  %v355_v20 = vrot.slane %v354_v15, 4  ;;  %v545_v21 = vsel %vm376_vm2, 1.0, %v604_v5  ;;  %v399_v22 = vrot.slane %v662_v16, 4 }
  0x19   : > { %v332_v23 = vrot.slane %v331_v17, 2  ;;  %v338_v24 = vadd.f32 %v337_v18, %v336_v14  ;;  %v422_v27 = vrot.slane %v545_v21, 4  ;;  %v311_v29 = vsel %vm310_vm0, %v306_v13, 0.0 }
  0x1a   : > { %v350_v25 = vrot.slane %v349_v19, 2  ;;  %v356_v26 = vadd.f32 %v355_v20, %v354_v15  ;;  %v398_v34 = vld [vmem:[%s655_s30 + $0x1] sm:$0x1]  ;;  %v421_v35 = vld [vmem:[%s655_s30 + $0x3] sm:$0x1]  ;;  %v312_v36 = vrot.slane %v311_v29, 4  ;;  %v401_v38 = vadd.f32 %v662_v16, %v399_v22 }
  0x1b   : > { %v333_v30 = vadd.f32 %v332_v23, %v331_v17  ;;  %v339_v31 = vrot.slane %v338_v24, 2  ;;  %v318_v37 = vsel %vm310_vm0, %v308_v28, 0.0  ;;  %v424_v39 = vadd.f32 %v545_v21, %v422_v27 }
  0x1c   : > { %v351_v32 = vadd.f32 %v350_v25, %v349_v19  ;;  %v357_v33 = vrot.slane %v356_v26, 2  ;;  %v313_v44 = vadd.f32 %v312_v36, %v311_v29  ;;  %v319_v45 = vrot.slane %v318_v37, 4  ;;  %v381_v25 = vld [vmem:[%s655_s30] sm:$0x1] }
  0x1d   : > { %v334_v40 = vrot.slane %v333_v30, 1  ;;  %v340_v41 = vadd.f32 %v339_v31, %v338_v24  ;;  %v402_v46 = vadd.f32 %v401_v38, %v398_v34  ;;  %v425_v47 = vadd.f32 %v424_v39, %v421_v35 }
  0x1e   : > { %v352_v42 = vrot.slane %v351_v32, 1  ;;  %v358_v43 = vadd.f32 %v357_v33, %v356_v26  ;;  %v314_v52 = vrot.slane %v313_v44, 2  ;;  %v320_v53 = vadd.f32 %v319_v45, %v318_v37  ;;  %v404_v26 = vld [vmem:[%s655_s30 + $0x2] sm:$0x1] }
  0x1f   : > { %v335_v48 = vadd.f32 %v334_v40, %v333_v30  ;;  %v341_v49 = vrot.slane %v340_v41, 1  ;;  %403 = vst [vmem:[%s655_s30 + $0x1] sm:$0x1] %v402_v46  ;;  %426 = vst [vmem:[%s655_s30 + $0x3] sm:$0x1] %v425_v47  ;;  %v385_v4 = vsub.s32 0, %v384_v1 }
  0x20   : > { %v353_v50 = vadd.f32 %v352_v42, %v351_v32  ;;  %v359_v51 = vrot.slane %v358_v43, 1  ;;  %v321_v57 = vrot.slane %v320_v53, 2  ;;  %v315_v60 = vadd.f32 %v314_v52, %v313_v44 }
  0x21   : > { %v342_v54 = vadd.f32 %v341_v49, %v340_v41  ;;  %v389_v7 = vsub.s32 4, %v384_v1  ;;  %v386_v10 = vrot.slane %v662_v16, %v385_v4  ;;  %v409_v11 = vrot.slane %v545_v21, %v385_v4 }
  0x22   : > { %v360_v55 = vadd.f32 %v359_v51, %v358_v43  ;;  %v361_v56 = vmul.f32 %v353_v50, %v335_v48  ;;  %v322_v63 = vadd.f32 %v321_v57, %v320_v53  ;;  %v316_v0 = vrot.slane %v315_v60, 1 }
  0x23   : > { %v390_v14 = vrot.slane %v662_v16, %v389_v7  ;;  %v413_v15 = vrot.slane %v545_v21, %v389_v7 }
  0x24   : > { %v362_v58 = vmul.f32 %v360_v55, %v342_v54  ;;  %v363_v59 = vmax.f32 %v361_v56, 1e-16  ;;  %v323_v2 = vrot.slane %v322_v63, 1  ;;  %v317_v3 = vadd.f32 %v316_v0, %v315_v60 }
  0x26   : > { %v364_v61 = vmax.f32 %v362_v58, 1e-16  ;;  %576 = vrsqrt.f32 %v363_v59  ;;  %v324_v5 = vadd.f32 %v323_v2, %v322_v63 }
  0x28   : > { %578 = vrsqrt.f32 %v364_v61 }
  0x30   : > { %v577_v6 = vpop.eup %576 }
  0x31   : > { %v367_v8 = vmul.f32 %v577_v6, %v317_v3 }
  0x32   : > { %v579_v9 = vpop.eup %578 }
  0x33   : > { %v368_v12 = vmul.f32 %v579_v9, %v324_v5  ;;  %v369_v13 = vmul.f32 0.5, %v367_v8 }
  0x35   : > { %v370_v17 = vmul.f32 0.5, %v368_v12  ;;  %v371_v18 = vsub.f32 0.5, %v369_v13 }
  0x37   : > { %v372_v19 = vsub.f32 0.5, %v370_v17  ;;  %v393_v20 = vmul.f32 %v386_v10, %v371_v18  ;;  %v416_v22 = vmul.f32 %v409_v11, %v371_v18 }
  0x39   : > { %v394_v23 = vmul.f32 %v390_v14, %v372_v19  ;;  %v417_v24 = vmul.f32 %v413_v15, %v372_v19 }
  0x3b   : > { %v395_v27 = vadd.f32 %v394_v23, %v393_v20  ;;  %v418_v28 = vadd.f32 %v417_v24, %v416_v22 }
  0x3d   : > { %v396_v29 = vadd.f32 %v395_v27, %v381_v25  ;;  %v419_v30 = vadd.f32 %v418_v28, %v404_v26 }
  0x3f   : > { %397 = vst [vmem:[%s655_s30] sm:$0x1] %v396_v29  ;;  %420 = vst [vmem:[%s655_s30 + $0x2] sm:$0x1] %v419_v30 }
  0x40 PF: > { %s13_s14 = sadd.s32 1, %s602_s14   ;;  %s691_s12 = smov %s598_s13 }
  0x41   : > { %p10_p5 = scmp.ge.s32.totalorder %s13_s14, 4   ;;  %s692_s13 = smov %s694_s15 }
  0x43   :  { %12 = sbr.rel (!%p10_p5) target bundleno = 2 (0x2), region = 72 }

</bundles_post_ra>
